<compile_context>
chip_gen: v7x
topology: tpu7x:2x2x1
jax: 0.10.0
libtpu: 0.0.40
codegen_flags: <defaults>
</compile_context>

<pallas_src>
import jax
import jax.numpy as jnp
from jax.experimental import pallas as pl
from jax.experimental.pallas import tpu as pltpu

_LANES = 128
_SUBLANES = 8
_TILE_R_MAX = 1024  # rows per block: 1024 x 128 x 4B = 512 KiB per buffer


def _affine_kernel(wb_ref, x_ref, o_ref):
    # wb_ref: SMEM (2,) f32 scalars [w, b] (scalar-prefetch arg)
    # x_ref:  VMEM (TILE_R, 128) lane-dense input tile
    # o_ref:  VMEM (TILE_R, 128) lane-dense output tile
    w = wb_ref[0]
    b = wb_ref[1]
    o_ref[...] = (x_ref[...] * w + b).astype(o_ref.dtype)


def _round_up(n, m):
    return ((n + m - 1) // m) * m


def linear_regression_v2(x, weight, bias):
    """x: (N, 1) f32, weight: (1, 1) f32, bias: (1,) f32 -> (N, 1) f32."""
    n = x.shape[0]
    dtype = x.dtype

    # Flatten to a lane-dense (rows, 128) view; pad so rows is a multiple of the tile.
    padded = _round_up(max(n, 1), _SUBLANES * _LANES)          # multiple of 1024 elems
    rows = padded // _LANES                                     # multiple of 8
    tile_r = min(_TILE_R_MAX, rows)                             # multiple of 8
    rows = _round_up(rows, tile_r)
    padded = rows * _LANES

    x_flat = jnp.pad(x.reshape(-1), (0, padded - n))
    x2 = x_flat.reshape(rows, _LANES)

    # Pack w and b as two SMEM scalars (scalar prefetch).
    wb = jnp.concatenate(
        [weight.reshape(1).astype(jnp.float32), bias.reshape(1).astype(jnp.float32)]
    )

    grid = (rows // tile_r,)

    out2 = pl.pallas_call(
        _affine_kernel,
        out_shape=jax.ShapeDtypeStruct((rows, _LANES), dtype),
        grid_spec=pltpu.PrefetchScalarGridSpec(
            num_scalar_prefetch=1,            # wb -> SMEM, passed as first kernel ref
            grid=grid,
            in_specs=[
                pl.BlockSpec((tile_r, _LANES), lambda i, wb_ref: (i, 0)),
            ],
            out_specs=pl.BlockSpec((tile_r, _LANES), lambda i, wb_ref: (i, 0)),
        ),
        compiler_params=pltpu.CompilerParams(
            dimension_semantics=("parallel",),
        ),
    )(wb, x2)

    # Slice off the padding and restore the (N, 1) PyTorch layout.
    return out2.reshape(-1)[:n].reshape(n, 1)


if __name__ == "__main__":
    key = jax.random.PRNGKey(0)
    kx, kw, kb = jax.random.split(key, 3)

    # Parameters with nn.Linear(1, 1) shapes.
    weight = jax.random.uniform(kw, (1, 1), jnp.float32, minval=-1.0, maxval=1.0)
    bias = jax.random.uniform(kb, (1,), jnp.float32, minval=-1.0, maxval=1.0)

    # Small input batch consistent with the forward: (N, in_features=1).
    x = jax.random.normal(kx, (8, 1), jnp.float32)

    out = linear_regression_v2(x, weight, bias)
    jax.block_until_ready(out)

    # Sanity-check against plain JAX reference (x @ W^T + b).
    ref = x @ weight.T + bias
    assert out.shape == (8, 1)
    assert jnp.allclose(out, ref, atol=1e-6), "mismatch vs reference"

    print("KERNEL_OK")
</pallas_src>

<mosaic_0001>
module attributes {stable_mosaic.version = 11 : i64} {
  func.func @_affine_kernel(%arg0: i32, %arg1: memref<2xf32, #tpu.memory_space<smem>>, %arg2: memref<8x128xf32, #tpu.memory_space<vmem>>, %arg3: memref<8x128xf32, #tpu.memory_space<vmem>>) attributes {dimension_semantics = [#tpu.dimension_semantics<parallel>], iteration_bounds = array<i64: 1>, scalar_prefetch = 1 : i64, scratch_operands = 0 : i64, tpu.core_type = #tpu.core_type<tc>, window_params = [{transform_indices = @transform_0, window_bounds = array<i64: 8, 128>}, {transform_indices = @transform_1, window_bounds = array<i64: 8, 128>}]} {
    %c0 = arith.constant 0 : index
    %0 = memref.load %arg1[%c0] : memref<2xf32, #tpu.memory_space<smem>>
    %c1 = arith.constant 1 : index
    %1 = memref.load %arg1[%c1] : memref<2xf32, #tpu.memory_space<smem>>
    %c0_0 = arith.constant 0 : index
    %c0_1 = arith.constant 0 : index
    %2 = vector.load %arg2[%c0_0, %c0_1] : memref<8x128xf32, #tpu.memory_space<vmem>>, vector<8x128xf32>
    %3 = vector.broadcast %0 : f32 to vector<8x128xf32>
    %4 = arith.mulf %2, %3 : vector<8x128xf32>
    %5 = vector.broadcast %1 : f32 to vector<8x128xf32>
    %6 = arith.addf %4, %5 : vector<8x128xf32>
    %c0_2 = arith.constant 0 : index
    %c0_3 = arith.constant 0 : index
    %7 = vector.load %arg3[%c0_2, %c0_3] : memref<8x128xf32, #tpu.memory_space<vmem>>, vector<8x128xf32>
    tpu.vector_store %arg3[%c0_2, %c0_3], %6 {strides = array<i32>} : memref<8x128xf32, #tpu.memory_space<vmem>>, vector<8x128xf32>,
    return
  }
  func.func @transform_0(%arg0: i32, %arg1: memref<2xf32, #tpu.memory_space<smem>>) -> (i32, i32) {
    %c0_i32 = arith.constant 0 : i32
    %c0_i32_0 = arith.constant 0 : i32
    return %arg0, %c0_i32 : i32, i32
  }
  func.func @transform_1(%arg0: i32, %arg1: memref<2xf32, #tpu.memory_space<smem>>) -> (i32, i32) {
    %c0_i32 = arith.constant 0 : i32
    %c0_i32_0 = arith.constant 0 : i32
    return %arg0, %c0_i32 : i32, i32
  }
}

</mosaic_0001>

<bundles_post_ra>
// kernel: tpu_custom_call.1
= control target key start
LH: loop header
LB: loop body
LE: loop exit
PB: predicated region body
PF: predicated region fallthrough
CT: control target
= control target key end

     0   :  { %s167_s0 = inlined_call_operand.hbm [shape: f32[2], index: 0, kind: input, shape index: {}]   ;;  %s168_s1 = inlined_call_operand.hbm [shape: f32[8,128], index: 1, kind: input, shape index: {}]   ;;  %s169_s2 = inlined_call_operand.hbm [shape: f32[8,128], index: 2, kind: output, shape index: {}]  }
   0x1   :  { %s53_s11 = scalar_lea.hbm %s167_s0, 16 }
   0x2   :  { %p54_p0 = scmp.ne.s32.totalorder %s167_s0, %s53_s11  ;;  %p57_p1 = scmp.lt.u32.totalorder %s53_s11, %s167_s0 }
   0x4   :  { %p59_p2 = pnand %p57_p1, %p54_p0 }
   0x6   :  { %62 = shalt.err (!%p59_p2)  }
   0x7   :  { %s113_s16 = smov [#allocation3]  }
   0x8   :  { %8 = dma.hbm_to_smem %s167_s0, 16, %s113_s16, [#allocation2] }
   0x9   :  { %107 = dma.done.wait [#allocation2], 16 }
   0xa   :  { %108 = vsyncadd [#allocation2], 4294967280 }
   0xb   :  { %10 = sfence }
   0xc   :  { %11 = vsyncpa [#allocation5], 0 }
   0xd   :  { %12 = vsyncpa [#allocation6], 0  ;;  %s114_s19 = smov [#allocation4]   ;;  %s63_s23 = scalar_lea.hbm %s168_s1, 128 }
   0xe   :  { %s19_s20 = sshll.u32 %s114_s19, 4  ;;  %p64_p3 = scmp.ne.s32.totalorder %s168_s1, %s63_s23  ;;  %s20_s20 = int_to_ptr.vmem [resolvable:$true] %s19_s20 }
   0xf   :  { %p67_p4 = scmp.lt.u32.totalorder %s63_s23, %s168_s1 }
  0x11   :  { %p69_p5 = pnand %p67_p4, %p64_p3 }
  0x13   :  { %72 = shalt.err (!%p69_p5)
}
  0x14   :  { %s73_s0 = scalar_lea.vmem %s20_s20, 128  ;;  %p78_p7 = scmp.lt.s32.totalorder %s20_s20, %s20_s20 }
  0x15   :  { %p74_p6 = scmp.ne.s32.totalorder %s20_s20, %s73_s0  ;;  %p79_p8 = scmp.lt.s32.totalorder %s73_s0, %s73_s0 }
  0x17   :  { %p80_p9 = por %p79_p8, %p78_p7 }
  0x19   :  { %p81_p10 = pnand %p80_p9, %p74_p6 }
  0x1b   :  { %84 = shalt.err (!%p81_p10)
}
  0x1c   :  { %22 = dma.hbm_to_vmem [thread:$0]  %s168_s1, 128, %s20_s20, [#allocation5]  }
  0x1d   :  { %109 = dma.done.wait [#allocation5], 128  }
  0x1e   :  { %110 = vsyncadd [#allocation5], 4294967168  ;;  %s26_s30 = sld [smem:[#allocation3]]  ;;  %s49_s3 = sld [smem:[#allocation3 + $0x1]]  ;;  %v28_v0 = vld [vmem:[#allocation4] sm:$0xff] }
  0x1f   :  { %s115_s4 = smov [#allocation7]  }
  0x20   :  { %s40_s5 = sshll.u32 %s115_s4, 4  ;;  %s41_s5 = int_to_ptr.vmem [resolvable:$true] %s40_s5 }
  0x21   :  { %s85_s6 = scalar_lea.vmem %s41_s5, 128  ;;  %p90_p12 = scmp.lt.s32.totalorder %s41_s5, %s41_s5 }
  0x22   :  { %p86_p11 = scmp.ne.s32.totalorder %s41_s5, %s85_s6  ;;  %p91_p13 = scmp.lt.s32.totalorder %s85_s6, %s85_s6 }
  0x24   :  { %v29_v1 = vstv %s26_s30  ;;  %v31_v2 = vstv %s49_s3  ;;  %p92_p0 = por %p91_p13, %p90_p12 }
  0x25   :  { %v30_v3 = vmul.f32 %v29_v1, %v28_v0 }
  0x26   :  { %p93_p1 = pnand %p92_p0, %p86_p11 }
  0x27   :  { %v32_v4 = vadd.f32 %v31_v2, %v30_v3 }
  0x29   :  { %33 = vst [vmem:[#allocation7] sm:$0xff] %v32_v4 }
  0x2a   :  { %96 = shalt.err (!%p93_p1)
}
  0x2b   :  { %s97_s8 = scalar_lea.hbm %s169_s2, 128 }
  0x2c   :  { %p98_p2 = scmp.ne.s32.totalorder %s169_s2, %s97_s8  ;;  %p101_p3 = scmp.lt.u32.totalorder %s97_s8, %s169_s2 }
  0x2e   :  { %p103_p4 = pnand %p101_p3, %p98_p2 }
  0x30   :  { %106 = shalt.err (!%p103_p4)
}
  0x31   :  { %43 = dma.vmem_to_hbm [thread:$0]  %s41_s5, 128, %s169_s2, [#allocation6]  }
  0x32   :  { %111 = dma.done.wait [#allocation6], 128  }
  0x33   :  { %112 = vsyncadd [#allocation6], 4294967168 }
  0x34   :  { %47 = vsyncpa [#allocation5], 1 }
  0x35   :  { %48 = vsyncpa [#allocation6], 1 }

</bundles_post_ra>
